<compile_context>
chip_gen: v5e
topology: v5e:2x2
jax: 0.10.0
libtpu: 0.0.40
codegen_flags: <defaults>
</compile_context>

<pallas_src>
import jax
import jax.numpy as jnp
from jax.experimental import pallas as pl
from jax.experimental.pallas import tpu as pltpu


def _normalize_tuple(t):
    n = float(sum(v * v for v in t) ** 0.5)
    return tuple(float(v) / n for v in t)


def make_anisotropy_kernel(ku: float, a0: float, a1: float, a2: float):
    """Returns kernel(sx_ref, sy_ref, sz_ref, geo_ref, e_ref) with constants baked in."""

    def kernel(sx_ref, sy_ref, sz_ref, geo_ref, e_ref):
        # Component reduction unrolled on the VPU with immediate weights.
        mh = sx_ref[...] * a0 + sy_ref[...] * a1 + sz_ref[...] * a2
        e_ref[...] = ku * (1.0 - mh * mh) * geo_ref[...]

    return kernel


def anisotropy_energy(spin, geo, Ms, *, ku, anis_axis, normalize=True,
                      lane=1024, block_rows=512):
    """JAX/Pallas equivalent of Anistropy(ku, anis_axis).forward(spin, geo, Ms).

    spin: (3, X, Y, Z) float32
    geo:  (X, Y, Z)    float32
    Ms:   unused (kept for signature parity with the PyTorch module)
    """
    del Ms  # unused in the reference forward
    if normalize:
        anis_axis = _normalize_tuple(anis_axis)
    a0, a1, a2 = (float(v) for v in anis_axis)

    C, X, Y, Z = spin.shape
    assert C == 3, "spin must have 3 components on the leading axis"
    N = X * Y * Z

    # --- Flatten voxels into a lane-dense 2D slab: (rows, lane), lane % 128 == 0.
    rows = pl.cdiv(N, lane)
    Np = rows * lane
    pad = Np - N

    spin_flat = spin.reshape(3, N)
    geo_flat = geo.reshape(N)
    if pad:
        # Padded voxels have geo == 0, so their energy is 0; cropped afterwards.
        spin_flat = jnp.pad(spin_flat, ((0, 0), (0, pad)))
        geo_flat = jnp.pad(geo_flat, (0, pad))

    # Three contiguous spin planes -> plain 2D tile DMAs (no strided 3-slab copy).
    sx = spin_flat[0].reshape(rows, lane)
    sy = spin_flat[1].reshape(rows, lane)
    sz = spin_flat[2].reshape(rows, lane)
    geo2d = geo_flat.reshape(rows, lane)

    # Row-block: biggest tile that fits the scoped-VMEM budget on all chips.
    #   tile = block_rows * lane * 4B = 2 MiB; steady state = 2 bufs * 5 streams
    #   * 2 MiB = 20 MiB, under the explicit 40 MiB scoped limit below (and
    #   well under v7x's 64 MiB physical VMEM).
    if rows <= block_rows:
        tr = rows                 # full extent -> no (8,128) divisibility needed
    else:
        tr = block_rows           # 512: multiple of 8 sublanes

    kernel = make_anisotropy_kernel(float(ku), a0, a1, a2)

    grid = (pl.cdiv(rows, tr),)

    cost = pl.CostEstimate(
        flops=9 * Np,                 # 3 mul + 2 add (mh) + mul + sub + 2 mul
        transcendentals=0,
        bytes_accessed=5 * Np * 4,    # 3 spin + geo read, E write (f32)
    )

    out2d = pl.pallas_call(
        kernel,
        out_shape=jax.ShapeDtypeStruct((rows, lane), spin.dtype),
        grid_spec=pl.GridSpec(
            grid=grid,
            in_specs=[
                pl.BlockSpec((tr, lane), lambda i: (i, 0)),  # spin_x
                pl.BlockSpec((tr, lane), lambda i: (i, 0)),  # spin_y
                pl.BlockSpec((tr, lane), lambda i: (i, 0)),  # spin_z
                pl.BlockSpec((tr, lane), lambda i: (i, 0)),  # geo
            ],
            out_specs=pl.BlockSpec((tr, lane), lambda i: (i, 0)),
        ),
        compiler_params=pltpu.CompilerParams(
            dimension_semantics=("parallel",),   # shards rows across v7x's 2 TCs
            vmem_limit_bytes=40 * 1024 * 1024,   # explicit: covers v5e's 16 MiB default
        ),
        cost_estimate=cost,
    )(sx, sy, sz, geo2d)

    return out2d.reshape(Np)[:N].reshape(X, Y, Z)


if __name__ == "__main__":
    key = jax.random.PRNGKey(0)
    k_spin, k_geo = jax.random.split(key)

    # Small shapes consistent with the module: spin (3, X, Y, Z), geo (X, Y, Z)
    X, Y, Z = 16, 8, 16
    spin = jax.random.normal(k_spin, (3, X, Y, Z), dtype=jnp.float32)
    # normalize spin vectors like a magnetization field (unit vectors)
    spin = spin / jnp.linalg.norm(spin, axis=0, keepdims=True)
    geo = (jax.random.uniform(k_geo, (X, Y, Z)) > 0.3).astype(jnp.float32)
    Ms = jnp.full((X, Y, Z), 8.0e5, dtype=jnp.float32)  # unused by forward

    ku = 5.0e4
    anis_axis = (0.0, 0.0, 1.0)

    E = anisotropy_energy(spin, geo, Ms, ku=ku, anis_axis=anis_axis)
    E = jax.block_until_ready(E)

    # Pure-JAX reference check
    axis_n = jnp.asarray(_normalize_tuple(anis_axis), jnp.float32).reshape(3, 1, 1, 1)
    mh_ref = (spin * axis_n).sum(axis=0)
    E_ref = ku * (1.0 - mh_ref ** 2) * geo
    assert E.shape == (X, Y, Z)
    assert jnp.allclose(E, E_ref, rtol=1e-5, atol=1e-3), "mismatch vs reference"

    print("KERNEL_OK")
</pallas_src>

<mosaic_0001>
module attributes {stable_mosaic.version = 11 : i64} {
  func.func @kernel(%arg0: i32, %arg1: memref<2x1024xf32, #tpu.memory_space<vmem>>, %arg2: memref<2x1024xf32, #tpu.memory_space<vmem>>, %arg3: memref<2x1024xf32, #tpu.memory_space<vmem>>, %arg4: memref<2x1024xf32, #tpu.memory_space<vmem>>, %arg5: memref<2x1024xf32, #tpu.memory_space<vmem>>) attributes {dimension_semantics = [#tpu.dimension_semantics<parallel>], iteration_bounds = array<i64: 1>, scalar_prefetch = 0 : i64, scratch_operands = 0 : i64, tpu.core_type = #tpu.core_type<tc>, window_params = [{transform_indices = @transform_0, window_bounds = array<i64: 2, 1024>}, {transform_indices = @transform_1, window_bounds = array<i64: 2, 1024>}, {transform_indices = @transform_2, window_bounds = array<i64: 2, 1024>}, {transform_indices = @transform_3, window_bounds = array<i64: 2, 1024>}, {transform_indices = @transform_4, window_bounds = array<i64: 2, 1024>}]} {
    %c0 = arith.constant 0 : index
    %c0_0 = arith.constant 0 : index
    %0 = vector.load %arg1[%c0, %c0_0] : memref<2x1024xf32, #tpu.memory_space<vmem>>, vector<2x1024xf32>
    %cst = arith.constant 0.000000e+00 : f32
    %1 = vector.broadcast %cst : f32 to vector<2x1024xf32>
    %2 = arith.mulf %0, %1 : vector<2x1024xf32>
    %c0_1 = arith.constant 0 : index
    %c0_2 = arith.constant 0 : index
    %3 = vector.load %arg2[%c0_1, %c0_2] : memref<2x1024xf32, #tpu.memory_space<vmem>>, vector<2x1024xf32>
    %cst_3 = arith.constant 0.000000e+00 : f32
    %4 = vector.broadcast %cst_3 : f32 to vector<2x1024xf32>
    %5 = arith.mulf %3, %4 : vector<2x1024xf32>
    %6 = arith.addf %2, %5 : vector<2x1024xf32>
    %c0_4 = arith.constant 0 : index
    %c0_5 = arith.constant 0 : index
    %7 = vector.load %arg3[%c0_4, %c0_5] : memref<2x1024xf32, #tpu.memory_space<vmem>>, vector<2x1024xf32>
    %cst_6 = arith.constant 1.000000e+00 : f32
    %8 = vector.broadcast %cst_6 : f32 to vector<2x1024xf32>
    %9 = arith.mulf %7, %8 : vector<2x1024xf32>
    %10 = arith.addf %6, %9 : vector<2x1024xf32>
    %11 = arith.mulf %10, %10 : vector<2x1024xf32>
    %cst_7 = arith.constant 1.000000e+00 : f32
    %12 = vector.broadcast %cst_7 : f32 to vector<2x1024xf32>
    %13 = arith.subf %12, %11 : vector<2x1024xf32>
    %cst_8 = arith.constant 5.000000e+04 : f32
    %14 = vector.broadcast %cst_8 : f32 to vector<2x1024xf32>
    %15 = arith.mulf %14, %13 : vector<2x1024xf32>
    %c0_9 = arith.constant 0 : index
    %c0_10 = arith.constant 0 : index
    %16 = vector.load %arg4[%c0_9, %c0_10] : memref<2x1024xf32, #tpu.memory_space<vmem>>, vector<2x1024xf32>
    %17 = arith.mulf %15, %16 : vector<2x1024xf32>
    %c0_11 = arith.constant 0 : index
    %c0_12 = arith.constant 0 : index
    %18 = vector.load %arg5[%c0_11, %c0_12] : memref<2x1024xf32, #tpu.memory_space<vmem>>, vector<2x1024xf32>
    tpu.vector_store %arg5[%c0_11, %c0_12], %17 {strides = array<i32>} : memref<2x1024xf32, #tpu.memory_space<vmem>>, vector<2x1024xf32>,
    return
  }
  func.func @transform_0(%arg0: i32) -> (i32, i32) {
    %c0_i32 = arith.constant 0 : i32
    %c0_i32_0 = arith.constant 0 : i32
    return %arg0, %c0_i32 : i32, i32
  }
  func.func @transform_1(%arg0: i32) -> (i32, i32) {
    %c0_i32 = arith.constant 0 : i32
    %c0_i32_0 = arith.constant 0 : i32
    return %arg0, %c0_i32 : i32, i32
  }
  func.func @transform_2(%arg0: i32) -> (i32, i32) {
    %c0_i32 = arith.constant 0 : i32
    %c0_i32_0 = arith.constant 0 : i32
    return %arg0, %c0_i32 : i32, i32
  }
  func.func @transform_3(%arg0: i32) -> (i32, i32) {
    %c0_i32 = arith.constant 0 : i32
    %c0_i32_0 = arith.constant 0 : i32
    return %arg0, %c0_i32 : i32, i32
  }
  func.func @transform_4(%arg0: i32) -> (i32, i32) {
    %c0_i32 = arith.constant 0 : i32
    %c0_i32_0 = arith.constant 0 : i32
    return %arg0, %c0_i32 : i32, i32
  }
}

</mosaic_0001>

<bundles_post_ra>
// kernel: tpu_custom_call.1
= control target key start
LH: loop header
LB: loop body
LE: loop exit
PB: predicated region body
PF: predicated region fallthrough
CT: control target
= control target key end

     0   :  { %9 = vsyncpa [#allocation3], 0  ;;  %s296_s0 = inlined_call_operand.hbm [shape: f32[2,1024], index: 0, kind: input, shape index: {}]   ;;  %s297_s1 = inlined_call_operand.hbm [shape: f32[2,1024], index: 1, kind: input, shape index: {}]   ;;  %s298_s2 = inlined_call_operand.hbm [shape: f32[2,1024], index: 2, kind: input, shape index: {}]   ;;  %s299_s3 = inlined_call_operand.hbm [shape: f32[2,1024], index: 3, kind: input, shape index: {}]   ;;  %s300_s4 = inlined_call_operand.hbm [shape: f32[2,1024], index: 4, kind: output, shape index: {}]  }
   0x1   :  { %10 = vsyncpa [#allocation6], 0 }
   0x2   :  { %11 = vsyncpa [#allocation9], 0  ;;  %s29_s17 = sshll.u32 %s297_s1, 4  ;;  %s30_s17 = int_to_ptr.hbm [resolvable:$true] %s29_s17 }
   0x3   :  { %12 = vsyncpa [#allocation4], 0  ;;  %s251_s18 = smov [#allocation5]   ;;  %s18_s22 = sshll.u32 %s296_s0, 4  ;;  %s19_s22 = int_to_ptr.hbm [resolvable:$true] %s18_s22 }
   0x4   :  { %s31_s19 = sshll.u32 %s251_s18, 4  ;;  %s252_s23 = smov [#allocation2]   ;;  %s32_s19 = int_to_ptr.vmem [resolvable:$true] %s31_s19 }
   0x5   :  { %34 = dma.hbm_to_vmem [thread:$0]  %s30_s17, 256, %s32_s19, [#allocation6]  }
   0x6   :  { %s20_s24 = sshll.u32 %s252_s23, 4  ;;  %s40_s27 = sshll.u32 %s298_s2, 4  ;;  %s21_s24 = int_to_ptr.vmem [resolvable:$true] %s20_s24  ;;  %s41_s27 = int_to_ptr.hbm [resolvable:$true] %s40_s27 }
   0x7   :  { %23 = dma.hbm_to_vmem [thread:$0]  %s19_s22, 256, %s21_s24, [#allocation3]  }
   0x8   :  { %s51_s29 = sshll.u32 %s299_s3, 4  ;;  %s253_s30 = smov [#allocation7]   ;;  %s52_s29 = int_to_ptr.hbm [resolvable:$true] %s51_s29 }
   0x9   :  { %s42_s5 = sshll.u32 %s253_s30, 4  ;;  %s254_s0 = smov [#allocation8]   ;;  %s43_s5 = int_to_ptr.vmem [resolvable:$true] %s42_s5 }
   0xa   :  { %45 = dma.hbm_to_vmem [thread:$0]  %s41_s27, 256, %s43_s5, [#allocation6]  }
   0xb   :  { %s53_s6 = sshll.u32 %s254_s0, 4  ;;  %s54_s6 = int_to_ptr.vmem [resolvable:$true] %s53_s6 }
   0xc   :  { %56 = dma.hbm_to_vmem [thread:$0]  %s52_s29, 256, %s54_s6, [#allocation9]  }
   0xd   :  { %243 = dma.done.wait [#allocation3], 256  }
   0xe   :  { %244 = vsyncadd [#allocation3], 4294967040 }
   0xf   :  { %245 = dma.done.wait [#allocation6], 512  }
  0x10   :  { %246 = vsyncadd [#allocation6], 4294966784 }
  0x11   :  { %247 = dma.done.wait [#allocation9], 256  }
  0x12   :  { %248 = vsyncadd [#allocation9], 4294967040  ;;  %v73_v0 = vld [vmem:[#allocation2] sm:$0xff]  ;;  %v77_v1 = vld [vmem:[#allocation5] sm:$0xff]  ;;  %s255_s2 = smov [#allocation10]   ;;  %s106_s9 = sshll.u32 %s300_s4, 4  ;;  %s107_s9 = int_to_ptr.hbm [resolvable:$true] %s106_s9 }
  0x13   :  { %v75_v2 = vmul.f32 0.0, %v73_v0  ;;  %v79_v3 = vmul.f32 0.0, %v77_v1  ;;  %v74_v4 = vld [vmem:[#allocation2 + $0x8] sm:$0xff]  ;;  %v78_v5 = vld [vmem:[#allocation5 + $0x8] sm:$0xff]  ;;  %v83_v6 = vld [vmem:[#allocation7] sm:$0xff]  ;;  %s104_s3 = sshll.u32 %s255_s2, 4  ;;  %s105_s3 = int_to_ptr.vmem [resolvable:$true] %s104_s3 }
  0x14   :  { %v76_v7 = vmul.f32 0.0, %v74_v4  ;;  %v80_v8 = vmul.f32 0.0, %v78_v5  ;;  %v84_v10 = vld [vmem:[#allocation7 + $0x8] sm:$0xff]  ;;  %v93_v17 = vld [vmem:[#allocation8] sm:$0xff]  ;;  %v94_v20 = vld [vmem:[#allocation8 + $0x8] sm:$0xff] }
  0x15   :  { %v81_v9 = vadd.f32 %v79_v3, %v75_v2 }
  0x16   :  { %v82_v11 = vadd.f32 %v80_v8, %v76_v7 }
  0x17   :  { %v85_v12 = vadd.f32 %v83_v6, %v81_v9 }
  0x18   :  { %v86_v13 = vadd.f32 %v84_v10, %v82_v11 }
  0x19   :  { %v87_v14 = vmul.f32 %v85_v12, %v85_v12 }
  0x1a   :  { %v88_v15 = vmul.f32 %v86_v13, %v86_v13 }
  0x1b   :  { %v89_v16 = vsub.f32 1.0, %v87_v14 }
  0x1c   :  { %v90_v18 = vsub.f32 1.0, %v88_v15 }
  0x1d   :  { %v91_v19 = vmul.f32 50000.0, %v89_v16 }
  0x1e   :  { %v92_v21 = vmul.f32 50000.0, %v90_v18 }
  0x1f   :  { %v95_v22 = vmul.f32 %v93_v17, %v91_v19 }
  0x20   :  { %v96_v23 = vmul.f32 %v94_v20, %v92_v21 }
  0x21   :  { %97 = vst [vmem:[#allocation10] sm:$0xff] %v95_v22 }
  0x22   :  { %98 = vst [vmem:[#allocation10 + $0x8] sm:$0xff] %v96_v23 }
  0x23   :  { %109 = dma.vmem_to_hbm [thread:$0]  %s105_s3, 256, %s107_s9, [#allocation4]  }
  0x24   :  { %249 = dma.done.wait [#allocation4], 256  }
  0x25   :  { %250 = vsyncadd [#allocation4], 4294967040 }
  0x26   :  { %114 = vsyncpa [#allocation3], 1 }
  0x27   :  { %115 = vsyncpa [#allocation6], 1 }
  0x28   :  { %116 = vsyncpa [#allocation9], 1 }
  0x29   :  { %117 = vsyncpa [#allocation4], 1 }

</bundles_post_ra>
